<compile_context>
chip_gen: v6e
topology: v6e:2x2x1
jax: 0.10.0
libtpu: 0.0.40
codegen_flags: <defaults>
</compile_context>

<pallas_src>
import jax
import jax.numpy as jnp
from jax.experimental import pallas as pl
from jax.experimental.pallas import tpu as pltpu


def _round_up(a, b):
    return (a + b - 1) // b * b


def _pick_row_tile(rows, k, cout_pad, in_bytes, out_bytes,
                   budget_bytes=32 * 1024 * 1024):
    """Largest row tile whose estimated VMEM working set fits the budget."""
    cap = _round_up(max(rows, 1), 8)
    for cand in (1024, 512, 256, 128, 64, 32, 16, 8):
        est = (2 * cand * k * in_bytes            # double-buffered patch tile
               + 2 * k * cout_pad * in_bytes      # weight (2 pipeline buffers)
               + 2 * cand * cout_pad * out_bytes  # double-buffered out tile
               + 2 * 8 * cout_pad * 4)            # bias
        if est <= budget_bytes:
            return min(cand, cap)
    return min(8, cap)


def _downsample_matmul_kernel(x_ref, w_ref, b_ref, o_ref):
    # x_ref: (TM, 9*C_in)   im2col rows (contiguous, no in-kernel relayout)
    # w_ref: (9*C_in, C_out_pad)
    # b_ref: (1, C_out_pad) float32
    # o_ref: (TM, C_out_pad)  lane-dense output tile
    acc = jnp.dot(x_ref[...], w_ref[...], preferred_element_type=jnp.float32)
    o_ref[...] = (acc + b_ref[...]).astype(o_ref.dtype)


def downsample(x_nchw, weight, bias, *, compute_dtype=None, row_tile=None):
    """Conv2d(dim, dim, 3, stride=2, padding=1); NCHW in, NCHW out."""
    N, C, H, W = x_nchw.shape
    C_out, C_in, KH, KW = weight.shape
    assert (KH, KW) == (3, 3) and C_in == C

    # PyTorch output size for k=3, stride=2, pad=1 (works for odd H/W too).
    H_out = (H - 1) // 2 + 1
    W_out = (W - 1) // 2 + 1
    HP, WP = H_out + 1, W_out + 1

    cdtype = jnp.dtype(compute_dtype) if compute_dtype is not None \
        else jnp.dtype(x_nchw.dtype)
    out_dtype = x_nchw.dtype

    # ---- layout glue (wrapper-side only, no conv compute) ------------------
    # NCHW -> NHWC, zero-pad (PyTorch padding=1; the extra bottom/right pad
    # rows only make the spatial dims even and are never read), then extract
    # the 9 strided taps as contiguous (N, H_out, W_out, C) slabs and
    # concatenate along channels -> im2col matrix (rows, 9*C).
    x = jnp.transpose(x_nchw, (0, 2, 3, 1))
    x = jnp.pad(x, ((0, 0),
                    (1, 2 * H_out + 1 - H),
                    (1, 2 * W_out + 1 - W),
                    (0, 0)))
    x = x.reshape(N, HP, 2, WP, 2, C)

    slabs = []
    for kh in range(3):
        dh, p = divmod(kh, 2)              # padded row = 2*(h+dh) + p
        for kw in range(3):
            dw, q = divmod(kw, 2)          # padded col = 2*(w+dw) + q
            slabs.append(x[:, dh:dh + H_out, p, dw:dw + W_out, q, :])
    K = 9 * C_in
    patches = jnp.concatenate(slabs, axis=-1).reshape(N * H_out * W_out, K)
    patches = patches.astype(cdtype)

    # Weight -> (9*C_in, C_out) with taps in the same (kh, kw, cin) order as
    # the patch columns; pad C_out to a multiple of 128 for lane-dense stores.
    w = jnp.transpose(weight, (2, 3, 1, 0)).reshape(K, C_out).astype(cdtype)
    b = bias.astype(jnp.float32)
    Cp = _round_up(C_out, 128)
    if Cp != C_out:
        w = jnp.pad(w, ((0, 0), (0, Cp - C_out)))
        b = jnp.pad(b, (0, Cp - C_out))
    b = b.reshape(1, Cp)

    rows = N * H_out * W_out
    tm = row_tile or _pick_row_tile(rows, K, Cp,
                                    jnp.dtype(cdtype).itemsize,
                                    jnp.dtype(out_dtype).itemsize)
    rows_pad = _round_up(rows, tm)
    if rows_pad != rows:
        patches = jnp.pad(patches, ((0, rows_pad - rows), (0, 0)))

    out_flat = pl.pallas_call(
        _downsample_matmul_kernel,
        out_shape=jax.ShapeDtypeStruct((rows_pad, Cp), out_dtype),
        grid=(rows_pad // tm,),
        in_specs=[
            pl.BlockSpec((tm, K), lambda i: (i, 0)),
            pl.BlockSpec((K, Cp), lambda i: (0, 0)),
            pl.BlockSpec((1, Cp), lambda i: (0, 0)),
        ],
        out_specs=pl.BlockSpec((tm, Cp), lambda i: (i, 0)),
        compiler_params=pltpu.CompilerParams(
            dimension_semantics=("parallel",),
            vmem_limit_bytes=48 * 1024 * 1024),
    )(patches, w, b)

    out = out_flat[:rows, :C_out].reshape(N, H_out, W_out, C_out)
    return jnp.transpose(out, (0, 3, 1, 2))   # back to NCHW


# TODO(synk): only the Downsample (strided 3x3 conv) submodule of the UNet is
# implemented as a Pallas kernel here; the full UNet graph (GroupNorm, Swish,
# attention, resblocks) is out of scope for this kernel.

if __name__ == "__main__":
    key = jax.random.PRNGKey(0)
    kx, kw, kb, kx2 = jax.random.split(key, 4)

    N, dim, H, W = 2, 4, 16, 16
    x = jax.random.normal(kx, (N, dim, H, W), dtype=jnp.float32)

    # Deterministic synthetic Conv2d(dim, dim, 3) parameters
    # (uniform in +-1/sqrt(fan_in), like torch's default init scale).
    fan_in = dim * 3 * 3
    bound = 1.0 / (fan_in ** 0.5)
    weight = jax.random.uniform(kw, (dim, dim, 3, 3), jnp.float32,
                                minval=-bound, maxval=bound)
    bias = jax.random.uniform(kb, (dim,), jnp.float32,
                              minval=-bound, maxval=bound)

    def ref_conv(xi, wi, bi):
        r = jax.lax.conv_general_dilated(
            xi, wi, window_strides=(2, 2), padding=((1, 1), (1, 1)),
            dimension_numbers=("NCHW", "OIHW", "NCHW"))
        return r + bi[None, :, None, None]

    # f32 path
    out = jax.block_until_ready(downsample(x, weight, bias))
    ref = ref_conv(x, weight, bias)
    assert out.shape == (N, dim, H // 2, W // 2), out.shape
    assert jnp.allclose(out, ref, atol=1e-5, rtol=1e-5), \
        float(jnp.max(jnp.abs(out - ref)))

    # bf16-operand fast path (f32 accumulation) — looser tolerance.
    out_bf16 = jax.block_until_ready(
        downsample(x, weight, bias, compute_dtype=jnp.bfloat16))
    assert jnp.allclose(out_bf16, ref, atol=5e-2, rtol=5e-2), \
        float(jnp.max(jnp.abs(out_bf16 - ref)))

    # Odd spatial size (PyTorch Conv2d handles these; v1 asserted them out).
    H2, W2 = 15, 13
    x2 = jax.random.normal(kx2, (N, dim, H2, W2), dtype=jnp.float32)
    out2 = jax.block_until_ready(downsample(x2, weight, bias))
    ref2 = ref_conv(x2, weight, bias)
    assert out2.shape == ref2.shape, (out2.shape, ref2.shape)
    assert jnp.allclose(out2, ref2, atol=1e-5, rtol=1e-5), \
        float(jnp.max(jnp.abs(out2 - ref2)))

    print("KERNEL_OK")
</pallas_src>

<mosaic_0001>
module attributes {stable_mosaic.version = 11 : i64} {
  func.func @_downsample_matmul_kernel(%arg0: i32, %arg1: memref<128x36xf32, #tpu.memory_space<vmem>>, %arg2: memref<36x128xf32, #tpu.memory_space<vmem>>, %arg3: memref<1x128xf32, #tpu.memory_space<vmem>>, %arg4: memref<128x128xf32, #tpu.memory_space<vmem>>) attributes {dimension_semantics = [#tpu.dimension_semantics<parallel>], iteration_bounds = array<i64: 1>, scalar_prefetch = 0 : i64, scratch_operands = 0 : i64, tpu.core_type = #tpu.core_type<tc>, window_params = [{transform_indices = @transform_0, window_bounds = array<i64: 128, 36>}, {pipeline_mode = #tpu.pipeline_mode<synchronous>, transform_indices = @transform_1, window_bounds = array<i64: 36, 128>}, {pipeline_mode = #tpu.pipeline_mode<synchronous>, transform_indices = @transform_2, window_bounds = array<i64: 1, 128>}, {transform_indices = @transform_3, window_bounds = array<i64: 128, 128>}]} {
    %c0 = arith.constant 0 : index
    %c0_0 = arith.constant 0 : index
    %0 = vector.load %arg1[%c0, %c0_0] : memref<128x36xf32, #tpu.memory_space<vmem>>, vector<128x36xf32>
    %c0_1 = arith.constant 0 : index
    %c0_2 = arith.constant 0 : index
    %1 = vector.load %arg2[%c0_1, %c0_2] : memref<36x128xf32, #tpu.memory_space<vmem>>, vector<36x128xf32>
    %cst = arith.constant dense<0.000000e+00> : vector<128x128xf32>
    %2 = tpu.matmul %0, %1, %cst {dimension_numbers = #tpu.dot_dimension_numbers<[1], [0], [0], [1], [0, 0, 1, 1], [], []>} : vector<128x36xf32>, vector<36x128xf32>, vector<128x128xf32> -> vector<128x128xf32>
    %c0_3 = arith.constant 0 : index
    %c0_4 = arith.constant 0 : index
    %3 = vector.load %arg3[%c0_3, %c0_4] : memref<1x128xf32, #tpu.memory_space<vmem>>, vector<1x128xf32>
    %4 = vector.broadcast %3 : vector<1x128xf32> to vector<128x128xf32>
    %5 = arith.addf %2, %4 : vector<128x128xf32>
    %c0_5 = arith.constant 0 : index
    %c0_6 = arith.constant 0 : index
    %6 = vector.load %arg4[%c0_5, %c0_6] : memref<128x128xf32, #tpu.memory_space<vmem>>, vector<128x128xf32>
    tpu.vector_store %arg4[%c0_5, %c0_6], %5 {strides = array<i32>} : memref<128x128xf32, #tpu.memory_space<vmem>>, vector<128x128xf32>,
    return
  }
  func.func @transform_0(%arg0: i32) -> (i32, i32) {
    %c0_i32 = arith.constant 0 : i32
    %c0_i32_0 = arith.constant 0 : i32
    return %arg0, %c0_i32 : i32, i32
  }
  func.func @transform_1(%arg0: i32) -> (i32, i32) {
    %c0_i32 = arith.constant 0 : i32
    %c0_i32_0 = arith.constant 0 : i32
    %c0_i32_1 = arith.constant 0 : i32
    return %c0_i32, %c0_i32_0 : i32, i32
  }
  func.func @transform_2(%arg0: i32) -> (i32, i32) {
    %c0_i32 = arith.constant 0 : i32
    %c0_i32_0 = arith.constant 0 : i32
    %c0_i32_1 = arith.constant 0 : i32
    return %c0_i32, %c0_i32_0 : i32, i32
  }
  func.func @transform_3(%arg0: i32) -> (i32, i32) {
    %c0_i32 = arith.constant 0 : i32
    %c0_i32_0 = arith.constant 0 : i32
    return %arg0, %c0_i32 : i32, i32
  }
}

</mosaic_0001>

<bundles_post_ra>
// kernel: tpu_custom_call.1
= control target key start
LH: loop header
LB: loop body
LE: loop exit
PB: predicated region body
PF: predicated region fallthrough
CT: control target
= control target key end

     0   :  { %vm92_vm0 = vcmask 1043456   ;;  %s489_s0 = inlined_call_operand.vmem [shape: f32[128,36], index: 0, kind: input, shape index: {}]   ;;  %s490_s1 = inlined_call_operand.vmem [shape: f32[36,128], index: 1, kind: input, shape index: {}]   ;;  %s491_s2 = inlined_call_operand.vmem [shape: f32[1,128], index: 2, kind: input, shape index: {}]   ;;  %s492_s3 = inlined_call_operand.hbm [shape: f32[128,128], index: 3, kind: output, shape index: {}]  }
   0x1   :  { %v35_v0 = vld [vmem:[%s490_s1 + $0x20] sm:$0xf]  ;;  %v34_v1 = vld [vmem:[%s490_s1 + $0x18] sm:$0xff]  ;;  %v33_v2 = vld [vmem:[%s490_s1 + $0x10] sm:$0xff] }
   0x2   :  { %312 = vmatprep.subr.msk.mxu0 %vm92_vm0, %v35_v0  ;;  %346 = vmatprep.subr.msk.mxu1 %vm92_vm0, %v35_v0  ;;  %v32_v3 = vld [vmem:[%s490_s1 + $0x8] sm:$0xff]  ;;  %v31_v4 = vld [vmem:[%s490_s1] sm:$0xff] }
   0x3   :  { %313 = vmatpush3.msk.msra.mxu0 %vm92_vm0, %v35_v0  ;;  %351 = vmatpush3.msk.msra.mxu1 %vm92_vm0, %v35_v0 }
   0x4   :  { %314 = vmatprep.subr.mxu0 %v34_v1  ;;  %347 = vmatprep.subr.mxu1 %v34_v1 }
   0x5   :  { %315 = vmatpush3.msra.mxu0 %v34_v1  ;;  %352 = vmatpush3.msra.mxu1 %v34_v1 }
   0x6   :  { %316 = vmatprep.subr.mxu0 %v33_v2  ;;  %348 = vmatprep.subr.mxu1 %v33_v2 }
   0x7   :  { %317 = vmatpush3.msra.mxu0 %v33_v2  ;;  %353 = vmatpush3.msra.mxu1 %v33_v2 }
   0x8   :  { %318 = vmatprep.subr.mxu0 %v32_v3  ;;  %349 = vmatprep.subr.mxu1 %v32_v3 }
   0x9   :  { %8 = vsyncpa [#allocation3], 0  ;;  %319 = vmatpush3.msra.mxu0 %v32_v3  ;;  %354 = vmatpush3.msra.mxu1 %v32_v3  ;;  %v15_v5 = vld [vmem:[%s489_s0] sm:$0xff]  ;;  %vm43_vm1 = vcmask 293888   ;;  %v16_v7 = vld [vmem:[%s489_s0 + $0x8] sm:$0xff] }
   0xa   :  { %v23_v6 = vld [vmem:[%s489_s0 + $0x40] sm:$0xff]  ;;  %320 = vmatprep.subr.mxu0 %v31_v4  ;;  %350 = vmatprep.subr.mxu1 %v31_v4  ;;  %v24_v8 = vld [vmem:[%s489_s0 + $0x48] sm:$0xff]  ;;  %v17_v9 = vld [vmem:[%s489_s0 + $0x10] sm:$0xff] }
   0xb   :  { %321 = vmatpush3.msra.mxu0 %v31_v4  ;;  %355 = vmatpush3.msra.mxu1 %v31_v4  ;;  %v25_v10 = vld [vmem:[%s489_s0 + $0x50] sm:$0xff]  ;;  %v18_v11 = vld [vmem:[%s489_s0 + $0x18] sm:$0xff]  ;;  %v19_v13 = vld [vmem:[%s489_s0 + $0x20] sm:$0xff] }
   0xc   :  { %322 = vmatprep.mubr.msk.f32.mxu0 %vm43_vm1, %v15_v5  ;;  %334 = vmatprep.mubr.msk.f32.mxu1 %vm43_vm1, %v23_v6  ;;  %v26_v12 = vld [vmem:[%s489_s0 + $0x58] sm:$0xff]  ;;  %v27_v14 = vld [vmem:[%s489_s0 + $0x60] sm:$0xff]  ;;  %v20_v15 = vld [vmem:[%s489_s0 + $0x28] sm:$0xff] }
   0xd   :  { %323 = vmatmul.mubr.msk.f32.vlgmr.msra.gmra.mxu0 %vm43_vm1, %v16_v7  ;;  %335 = vmatmul.mubr.msk.f32.vlgmr.msra.gmra.mxu1 %vm43_vm1, %v24_v8  ;;  %v28_v16 = vld [vmem:[%s489_s0 + $0x68] sm:$0xff]  ;;  %v21_v17 = vld [vmem:[%s489_s0 + $0x30] sm:$0xff]  ;;  %v22_v19 = vld [vmem:[%s489_s0 + $0x38] sm:$0xff] }
   0xe   :  { %325 = vmatprep.mubr.msk.f32.mxu0 %vm43_vm1, %v17_v9  ;;  %337 = vmatprep.mubr.msk.f32.mxu1 %vm43_vm1, %v25_v10  ;;  %v29_v18 = vld [vmem:[%s489_s0 + $0x70] sm:$0xff]  ;;  %v30_v20 = vld [vmem:[%s489_s0 + $0x78] sm:$0xff]  ;;  %v273_v21 = vld [vmem:[%s491_s2] ss:$0 sm:$0xff]  ;;  %s381_s0 = smov [#allocation2]  }
   0xf   :  { %s262_s2 = sshll.u32 %s381_s0, 4  ;;  %s263_s2 = int_to_ptr.vmem [resolvable:$true] %s262_s2 }
  0x10   :  { %s359_s1 = scalar_lea.vmem %s263_s2, 2048  ;;  %p364_p1 = scmp.lt.s32.totalorder %s263_s2, %s263_s2 }
  0x11   :  { %326 = vmatmul.mubr.msk.f32.gmra.mxu0 %vm43_vm1, %v18_v11  ;;  %338 = vmatmul.mubr.msk.f32.gmra.mxu1 %vm43_vm1, %v26_v12  ;;  %p360_p0 = scmp.ne.s32.totalorder %s263_s2, %s359_s1  ;;  %p365_p2 = scmp.lt.s32.totalorder %s359_s1, %s359_s1 }
  0x12   :  { %328 = vmatprep.mubr.msk.f32.mxu0 %vm43_vm1, %v19_v13  ;;  %340 = vmatprep.mubr.msk.f32.mxu1 %vm43_vm1, %v27_v14 }
  0x13   :  { %p366_p3 = por %p365_p2, %p364_p1 }
  0x15   :  { %329 = vmatmul.mubr.msk.f32.gmra.mxu0 %vm43_vm1, %v20_v15  ;;  %341 = vmatmul.mubr.msk.f32.gmra.mxu1 %vm43_vm1, %v28_v16  ;;  %p367_p4 = pnand %p366_p3, %p360_p0 }
  0x16   :  { %331 = vmatprep.mubr.msk.f32.mxu0 %vm43_vm1, %v21_v17  ;;  %343 = vmatprep.mubr.msk.f32.mxu1 %vm43_vm1, %v29_v18 }
  0x19   :  { %332 = vmatmul.mubr.msk.f32.gmra.mxu0 %vm43_vm1, %v22_v19  ;;  %344 = vmatmul.mubr.msk.f32.gmra.mxu1 %vm43_vm1, %v30_v20 }
  0xcd   :  { %v324_v22 = vpop.f32.mrf.mxu0  ;;  %v336_v23 = vpop.f32.mrf.mxu1 }
  0xce   :  { %v168_v24 = vadd.f32 %v324_v22, %v273_v21  ;;  %v208_v25 = vadd.f32 %v336_v23, %v273_v21 }
  0xcf   :  { %v162_v26 = vpop.f32.mrf.mxu0  ;;  %v202_v27 = vpop.f32.mrf.mxu1 }
  0xd0   :  { %242 = vst [vmem:[#allocation2 + $0x8] sm:$0xff] %v168_v24  ;;  %250 = vst [vmem:[#allocation2 + $0x48] sm:$0xff] %v208_v25  ;;  %v163_v28 = vadd.f32 %v273_v21, %v162_v26  ;;  %v203_v29 = vadd.f32 %v273_v21, %v202_v27 }
  0xd1   :  { %v327_v30 = vpop.f32.mrf.mxu0  ;;  %v339_v31 = vpop.f32.mrf.mxu1 }
  0xd2   :  { %241 = vst [vmem:[#allocation2] sm:$0xff] %v163_v28  ;;  %249 = vst [vmem:[#allocation2 + $0x40] sm:$0xff] %v203_v29  ;;  %v178_v32 = vadd.f32 %v327_v30, %v273_v21  ;;  %v218_v33 = vadd.f32 %v339_v31, %v273_v21 }
  0xd3   :  { %v172_v34 = vpop.f32.mrf.mxu0  ;;  %v212_v35 = vpop.f32.mrf.mxu1 }
  0xd4   :  { %244 = vst [vmem:[#allocation2 + $0x18] sm:$0xff] %v178_v32  ;;  %252 = vst [vmem:[#allocation2 + $0x58] sm:$0xff] %v218_v33  ;;  %v173_v36 = vadd.f32 %v273_v21, %v172_v34  ;;  %v213_v37 = vadd.f32 %v273_v21, %v212_v35 }
  0xd5   :  { %v330_v38 = vpop.f32.mrf.mxu0  ;;  %v342_v39 = vpop.f32.mrf.mxu1 }
  0xd6   :  { %243 = vst [vmem:[#allocation2 + $0x10] sm:$0xff] %v173_v36  ;;  %251 = vst [vmem:[#allocation2 + $0x50] sm:$0xff] %v213_v37  ;;  %v188_v40 = vadd.f32 %v330_v38, %v273_v21  ;;  %v228_v41 = vadd.f32 %v342_v39, %v273_v21 }
  0xd7   :  { %v182_v42 = vpop.f32.mrf.mxu0  ;;  %v222_v43 = vpop.f32.mrf.mxu1 }
  0xd8   :  { %246 = vst [vmem:[#allocation2 + $0x28] sm:$0xff] %v188_v40  ;;  %254 = vst [vmem:[#allocation2 + $0x68] sm:$0xff] %v228_v41  ;;  %v183_v44 = vadd.f32 %v273_v21, %v182_v42  ;;  %v223_v45 = vadd.f32 %v273_v21, %v222_v43 }
  0xd9   :  { %v333_v46 = vpop.f32.mrf.mxu0  ;;  %v345_v47 = vpop.f32.mrf.mxu1 }
  0xda   :  { %245 = vst [vmem:[#allocation2 + $0x20] sm:$0xff] %v183_v44  ;;  %253 = vst [vmem:[#allocation2 + $0x60] sm:$0xff] %v223_v45  ;;  %v198_v48 = vadd.f32 %v333_v46, %v273_v21  ;;  %v238_v49 = vadd.f32 %v345_v47, %v273_v21 }
  0xdb   :  { %v192_v50 = vpop.f32.mrf.mxu0  ;;  %v232_v51 = vpop.f32.mrf.mxu1 }
  0xdc   :  { %248 = vst [vmem:[#allocation2 + $0x38] sm:$0xff] %v198_v48  ;;  %256 = vst [vmem:[#allocation2 + $0x78] sm:$0xff] %v238_v49  ;;  %v193_v52 = vadd.f32 %v273_v21, %v192_v50  ;;  %v233_v53 = vadd.f32 %v273_v21, %v232_v51 }
  0xde   :  { %247 = vst [vmem:[#allocation2 + $0x30] sm:$0xff] %v193_v52  ;;  %255 = vst [vmem:[#allocation2 + $0x70] sm:$0xff] %v233_v53 }
  0xdf   :  { %370 = shalt.err (!%p367_p4)
}
  0xe0   :  { %s382_s28 = smov 128   ;;  %s383_s29 = smov 8  }
  0xe1   :  { %268 = dma.vmem_to_hbm [thread:$0]  %s263_s2, 2048, %s492_s3, [#allocation3], %s382_s28, %s382_s28, %s383_s29  }
  0xe2   :  { %379 = dma.done.wait [#allocation3], 2048  }
  0xe3   :  { %380 = vsyncadd [#allocation3], 4294965248 }
  0xe4   :  { %272 = vsyncpa [#allocation3], 1 }

</bundles_post_ra>
